<compile_context>
chip_gen: v7x
topology: tpu7x:2x2x1
jax: 0.10.0
libtpu: 0.0.40
codegen_flags: <defaults>
</compile_context>

<pallas_src>
import jax
import jax.numpy as jnp
from jax.experimental import pallas as pl
from jax.experimental.pallas import tpu as pltpu

EPS = 1e-5
LANES = 128


# ---------------------------------------------------------------------------
# In-kernel helpers
# ---------------------------------------------------------------------------
def _conv3x3_packed(x, a_ref, s_prev, s_next):
    """3x3 SAME conv on lane-packed rows x: (N*H, W*Cp).

    p_dy = x @ A[dy] (three MXU matmuls, W border baked into the banded A).
    The dy=0 / dy=2 products are realigned by one image row via small shift
    matrices (boundary mask baked in):  (S_prev @ p0)[r] = p0[r-1] within the
    same image (else 0), (S_next @ p2)[r] = p2[r+1] within the same image."""
    p0 = jnp.dot(x, a_ref[0], preferred_element_type=jnp.float32)
    p1 = jnp.dot(x, a_ref[1], preferred_element_type=jnp.float32)
    p2 = jnp.dot(x, a_ref[2], preferred_element_type=jnp.float32)
    y = p1
    y = y + jnp.dot(s_prev, p0, preferred_element_type=jnp.float32)
    y = y + jnp.dot(s_next, p2, preferred_element_type=jnp.float32)
    return y


def _bn_train(y, fold, gamma, beta):
    """Train-mode BatchNorm on lane-packed y: (N*H, W*Cp).

    fold: (W*Cp, W*Cp) matrix = (sum over the W lane-copies of each channel,
    broadcast back over W, pre-divided by N*H*W).  gamma/beta: (1, W*Cp)."""
    s1 = jnp.sum(y, axis=0, keepdims=True)
    s2 = jnp.sum(y * y, axis=0, keepdims=True)
    mean = jnp.dot(s1, fold, preferred_element_type=jnp.float32)
    ex2 = jnp.dot(s2, fold, preferred_element_type=jnp.float32)
    var = jnp.maximum(ex2 - mean * mean, 0.0)        # clamp: no NaN from cancellation
    scale = gamma * jax.lax.rsqrt(var + EPS)
    shift = beta - mean * scale
    return y * scale + shift


# ---------------------------------------------------------------------------
# The fused kernel
# ---------------------------------------------------------------------------
def _resblock_kernel(x_ref, a1_ref, a2_ref, sp_ref, sn_ref, fold_ref,
                     g1_ref, b1_ref, g2_ref, b2_ref, o_ref):
    x = x_ref[...]
    s_prev = sp_ref[...]
    s_next = sn_ref[...]
    fold = fold_ref[...]

    # conv1 (bias dropped: exactly cancelled by train-mode BN mean subtraction)
    y1 = _conv3x3_packed(x, a1_ref, s_prev, s_next)
    h1 = jnp.maximum(_bn_train(y1, fold, g1_ref[...], b1_ref[...]), 0.0)

    # conv2 -> bn2 -> residual add -> relu (intermediate never leaves VMEM)
    y2 = _conv3x3_packed(h1, a2_ref, s_prev, s_next)
    o = _bn_train(y2, fold, g2_ref[...], b2_ref[...]) + x
    o_ref[...] = jnp.maximum(o, 0.0)


# ---------------------------------------------------------------------------
# Wrapper glue (weight packing, lane padding, shift/fold matrices)
# ---------------------------------------------------------------------------
def _padded_channels(W, C):
    cp = C
    while (W * cp) % LANES != 0:
        cp += 1
    return cp


def _banded_weights(w_hwio, W, Cp):
    """(3,3,C,C) HWIO conv weights -> (3, W*Cp, W*Cp) block-banded matrices:
    packed_out_row(h) += packed_in_row(h + dy - 1) @ A[dy]."""
    C = w_hwio.shape[-1]
    wp = jnp.pad(w_hwio, ((0, 0), (0, 0), (0, Cp - C), (0, Cp - C)))
    a = sum(jnp.einsum("pq,dio->dpiqo",
                       jnp.eye(W, W, k=1 - dx, dtype=wp.dtype), wp[:, dx])
            for dx in range(3))
    return a.reshape(3, W * Cp, W * Cp)


def _shift_matrices(N, H):
    """(N*H, N*H) row-shift matrices with the image top/bottom mask baked in."""
    r = jnp.arange(N * H)
    prev = (r[:, None] - 1 == r[None, :]) & ((r % H) != 0)[:, None]
    nxt = (r[:, None] + 1 == r[None, :]) & ((r % H) != H - 1)[:, None]
    return prev.astype(jnp.float32), nxt.astype(jnp.float32)


def _fold_matrix(W, Cp, count):
    """F[w*Cp+c, w'*Cp+c'] = (c == c') / count  — per-channel mean fold."""
    return jnp.tile(jnp.eye(Cp, dtype=jnp.float32), (W, W)) / float(count)


def _lane_vec(v, W, Cp):
    """Per-channel (C,) vector -> lane-tiled (1, W*Cp), zero in padded channels."""
    return jnp.tile(jnp.pad(v, (0, Cp - v.shape[0])), W).reshape(1, W * Cp)


@jax.jit
def residual_block_pallas(x_nhwc, params):
    """x_nhwc: (N, H, W, C) float32. Returns (N, H, W, C) float32."""
    N, H, W, C = x_nhwc.shape
    Cp = _padded_channels(W, C)          # lane-dense: W*Cp is a multiple of 128
    WCp = W * Cp
    NH = N * H

    x_p = jnp.pad(x_nhwc, ((0, 0), (0, 0), (0, 0), (0, Cp - C))).reshape(NH, WCp)

    a1 = _banded_weights(params["w1"], W, Cp)
    a2 = _banded_weights(params["w2"], W, Cp)
    s_prev, s_next = _shift_matrices(N, H)
    fold = _fold_matrix(W, Cp, N * H * W)
    g1 = _lane_vec(params["g1"], W, Cp)
    b1 = _lane_vec(params["be1"], W, Cp)
    g2 = _lane_vec(params["g2"], W, Cp)
    b2 = _lane_vec(params["be2"], W, Cp)

    def full(shape):
        return pl.BlockSpec(shape, lambda i: (0,) * len(shape))

    out_p = pl.pallas_call(
        _resblock_kernel,
        grid=(1,),
        in_specs=[full((NH, WCp)),
                  full((3, WCp, WCp)), full((3, WCp, WCp)),
                  full((NH, NH)), full((NH, NH)),
                  full((WCp, WCp)),
                  full((1, WCp)), full((1, WCp)), full((1, WCp)), full((1, WCp))],
        out_specs=full((NH, WCp)),
        out_shape=jax.ShapeDtypeStruct((NH, WCp), jnp.float32),
        compiler_params=pltpu.CompilerParams(
            dimension_semantics=("arbitrary",)),
    )(x_p, a1, a2, s_prev, s_next, fold, g1, b1, g2, b2)

    return out_p.reshape(N, H, W, Cp)[..., :C]


# ---------------------------------------------------------------------------
# Deterministic parameter init (shapes per ResidualBlock.__init__(channels))
# ---------------------------------------------------------------------------
def init_params(key, channels):
    C = channels
    k1, k2, k3, k4 = jax.random.split(key, 4)
    bound = 1.0 / (C * 9) ** 0.5  # Conv2d fan_in-based uniform bound
    w1 = jax.random.uniform(k1, (3, 3, C, C), jnp.float32, -bound, bound)  # HWIO
    b1 = jax.random.uniform(k2, (C,), jnp.float32, -bound, bound)
    w2 = jax.random.uniform(k3, (3, 3, C, C), jnp.float32, -bound, bound)
    b2 = jax.random.uniform(k4, (C,), jnp.float32, -bound, bound)
    # BatchNorm2d defaults: gamma = 1, beta = 0
    return dict(w1=w1, b1=b1, g1=jnp.ones((C,), jnp.float32),
                be1=jnp.zeros((C,), jnp.float32),
                w2=w2, b2=b2, g2=jnp.ones((C,), jnp.float32),
                be2=jnp.zeros((C,), jnp.float32))


# ---------------------------------------------------------------------------
# Pure-JAX reference (lax conv + train-mode BN) for verification
# ---------------------------------------------------------------------------
def residual_block_ref(x_nhwc, p):
    def conv(x, w, b):
        y = jax.lax.conv_general_dilated(
            x, w, window_strides=(1, 1), padding="SAME",
            dimension_numbers=("NHWC", "HWIO", "NHWC"))
        return y + b

    def bn(y, g, be):
        m = y.mean(axis=(0, 1, 2), keepdims=True)
        v = ((y - m) ** 2).mean(axis=(0, 1, 2), keepdims=True)
        return (y - m) * jax.lax.rsqrt(v + EPS) * g + be

    o = jax.nn.relu(bn(conv(x_nhwc, p["w1"], p["b1"]), p["g1"], p["be1"]))
    o = bn(conv(o, p["w2"], p["b2"]), p["g2"], p["be2"])
    return jax.nn.relu(o + x_nhwc)


if __name__ == "__main__":
    key = jax.random.PRNGKey(0)
    kx, kp = jax.random.split(key)

    N, C, H, W = 2, 4, 16, 16
    x_nchw = jax.random.normal(kx, (N, C, H, W), jnp.float32)   # PyTorch layout
    x_nhwc = jnp.transpose(x_nchw, (0, 2, 3, 1))                # kernel layout
    params = init_params(kp, C)

    out = residual_block_pallas(x_nhwc, params)
    out = jax.block_until_ready(out)

    ref = residual_block_ref(x_nhwc, params)
    err = float(jnp.max(jnp.abs(out - ref)))
    assert out.shape == (N, H, W, C)
    assert err < 1e-4, f"mismatch vs reference: max abs err = {err}"
    print("KERNEL_OK")
</pallas_src>

<mosaic_0001>
module attributes {stable_mosaic.version = 11 : i64} {
  func.func @_resblock_kernel(%arg0: i32, %arg1: memref<32x128xf32, #tpu.memory_space<vmem>>, %arg2: memref<3x128x128xf32, #tpu.memory_space<vmem>>, %arg3: memref<3x128x128xf32, #tpu.memory_space<vmem>>, %arg4: memref<32x32xf32, #tpu.memory_space<vmem>>, %arg5: memref<32x32xf32, #tpu.memory_space<vmem>>, %arg6: memref<128x128xf32, #tpu.memory_space<vmem>>, %arg7: memref<1x128xf32, #tpu.memory_space<vmem>>, %arg8: memref<1x128xf32, #tpu.memory_space<vmem>>, %arg9: memref<1x128xf32, #tpu.memory_space<vmem>>, %arg10: memref<1x128xf32, #tpu.memory_space<vmem>>, %arg11: memref<32x128xf32, #tpu.memory_space<vmem>>) attributes {dimension_semantics = [#tpu.dimension_semantics<arbitrary>], iteration_bounds = array<i64: 1>, scalar_prefetch = 0 : i64, scratch_operands = 0 : i64, tpu.core_type = #tpu.core_type<tc>, window_params = [{pipeline_mode = #tpu.pipeline_mode<synchronous>, transform_indices = @transform_0, window_bounds = array<i64: 32, 128>}, {pipeline_mode = #tpu.pipeline_mode<synchronous>, transform_indices = @transform_1, window_bounds = array<i64: 3, 128, 128>}, {pipeline_mode = #tpu.pipeline_mode<synchronous>, transform_indices = @transform_2, window_bounds = array<i64: 3, 128, 128>}, {pipeline_mode = #tpu.pipeline_mode<synchronous>, transform_indices = @transform_3, window_bounds = array<i64: 32, 32>}, {pipeline_mode = #tpu.pipeline_mode<synchronous>, transform_indices = @transform_4, window_bounds = array<i64: 32, 32>}, {pipeline_mode = #tpu.pipeline_mode<synchronous>, transform_indices = @transform_5, window_bounds = array<i64: 128, 128>}, {pipeline_mode = #tpu.pipeline_mode<synchronous>, transform_indices = @transform_6, window_bounds = array<i64: 1, 128>}, {pipeline_mode = #tpu.pipeline_mode<synchronous>, transform_indices = @transform_7, window_bounds = array<i64: 1, 128>}, {pipeline_mode = #tpu.pipeline_mode<synchronous>, transform_indices = @transform_8, window_bounds = array<i64: 1, 128>}, {pipeline_mode = #tpu.pipeline_mode<synchronous>, transform_indices = @transform_9, window_bounds = array<i64: 1, 128>}, {pipeline_mode = #tpu.pipeline_mode<synchronous>, transform_indices = @transform_10, window_bounds = array<i64: 32, 128>}]} {
    %c0 = arith.constant 0 : index
    %c0_0 = arith.constant 0 : index
    %0 = vector.load %arg1[%c0, %c0_0] : memref<32x128xf32, #tpu.memory_space<vmem>>, vector<32x128xf32>
    %c0_1 = arith.constant 0 : index
    %c0_2 = arith.constant 0 : index
    %1 = vector.load %arg4[%c0_1, %c0_2] : memref<32x32xf32, #tpu.memory_space<vmem>>, vector<32x32xf32>
    %c0_3 = arith.constant 0 : index
    %c0_4 = arith.constant 0 : index
    %2 = vector.load %arg5[%c0_3, %c0_4] : memref<32x32xf32, #tpu.memory_space<vmem>>, vector<32x32xf32>
    %c0_5 = arith.constant 0 : index
    %c0_6 = arith.constant 0 : index
    %3 = vector.load %arg6[%c0_5, %c0_6] : memref<128x128xf32, #tpu.memory_space<vmem>>, vector<128x128xf32>
    %c0_7 = arith.constant 0 : index
    %c0_8 = arith.constant 0 : index
    %c0_9 = arith.constant 0 : index
    %4 = vector.load %arg2[%c0_7, %c0_8, %c0_9] : memref<3x128x128xf32, #tpu.memory_space<vmem>>, vector<1x128x128xf32>
    %5 = vector.shape_cast %4 : vector<1x128x128xf32> to vector<128x128xf32>
    %cst = arith.constant dense<0.000000e+00> : vector<32x128xf32>
    %6 = tpu.matmul %0, %5, %cst {dimension_numbers = #tpu.dot_dimension_numbers<[1], [0], [0], [1], [0, 0, 1, 1], [], []>} : vector<32x128xf32>, vector<128x128xf32>, vector<32x128xf32> -> vector<32x128xf32>
    %c1 = arith.constant 1 : index
    %c0_10 = arith.constant 0 : index
    %c0_11 = arith.constant 0 : index
    %7 = vector.load %arg2[%c1, %c0_10, %c0_11] : memref<3x128x128xf32, #tpu.memory_space<vmem>>, vector<1x128x128xf32>
    %8 = vector.shape_cast %7 : vector<1x128x128xf32> to vector<128x128xf32>
    %cst_12 = arith.constant dense<0.000000e+00> : vector<32x128xf32>
    %9 = tpu.matmul %0, %8, %cst_12 {dimension_numbers = #tpu.dot_dimension_numbers<[1], [0], [0], [1], [0, 0, 1, 1], [], []>} : vector<32x128xf32>, vector<128x128xf32>, vector<32x128xf32> -> vector<32x128xf32>
    %c2 = arith.constant 2 : index
    %c0_13 = arith.constant 0 : index
    %c0_14 = arith.constant 0 : index
    %10 = vector.load %arg2[%c2, %c0_13, %c0_14] : memref<3x128x128xf32, #tpu.memory_space<vmem>>, vector<1x128x128xf32>
    %11 = vector.shape_cast %10 : vector<1x128x128xf32> to vector<128x128xf32>
    %cst_15 = arith.constant dense<0.000000e+00> : vector<32x128xf32>
    %12 = tpu.matmul %0, %11, %cst_15 {dimension_numbers = #tpu.dot_dimension_numbers<[1], [0], [0], [1], [0, 0, 1, 1], [], []>} : vector<32x128xf32>, vector<128x128xf32>, vector<32x128xf32> -> vector<32x128xf32>
    %cst_16 = arith.constant dense<0.000000e+00> : vector<32x128xf32>
    %13 = tpu.matmul %1, %6, %cst_16 {dimension_numbers = #tpu.dot_dimension_numbers<[1], [0], [0], [1], [0, 0, 1, 1], [], []>} : vector<32x32xf32>, vector<32x128xf32>, vector<32x128xf32> -> vector<32x128xf32>
    %14 = arith.addf %9, %13 : vector<32x128xf32>
    %cst_17 = arith.constant dense<0.000000e+00> : vector<32x128xf32>
    %15 = tpu.matmul %2, %12, %cst_17 {dimension_numbers = #tpu.dot_dimension_numbers<[1], [0], [0], [1], [0, 0, 1, 1], [], []>} : vector<32x32xf32>, vector<32x128xf32>, vector<32x128xf32> -> vector<32x128xf32>
    %16 = arith.addf %14, %15 : vector<32x128xf32>
    %c0_18 = arith.constant 0 : index
    %c0_19 = arith.constant 0 : index
    %17 = vector.load %arg7[%c0_18, %c0_19] : memref<1x128xf32, #tpu.memory_space<vmem>>, vector<1x128xf32>
    %c0_20 = arith.constant 0 : index
    %c0_21 = arith.constant 0 : index
    %18 = vector.load %arg8[%c0_20, %c0_21] : memref<1x128xf32, #tpu.memory_space<vmem>>, vector<1x128xf32>
    %cst_22 = arith.constant dense<0.000000e+00> : vector<128xf32>
    %19 = vector.multi_reduction <add>, %16, %cst_22 [0] : vector<32x128xf32> to vector<128xf32>
    %20 = vector.shape_cast %19 : vector<128xf32> to vector<1x128xf32>
    %21 = arith.mulf %16, %16 : vector<32x128xf32>
    %cst_23 = arith.constant dense<0.000000e+00> : vector<128xf32>
    %22 = vector.multi_reduction <add>, %21, %cst_23 [0] : vector<32x128xf32> to vector<128xf32>
    %23 = vector.shape_cast %22 : vector<128xf32> to vector<1x128xf32>
    %cst_24 = arith.constant dense<0.000000e+00> : vector<1x128xf32>
    %24 = tpu.matmul %20, %3, %cst_24 {dimension_numbers = #tpu.dot_dimension_numbers<[1], [0], [0], [1], [0, 0, 1, 1], [], []>} : vector<1x128xf32>, vector<128x128xf32>, vector<1x128xf32> -> vector<1x128xf32>
    %cst_25 = arith.constant dense<0.000000e+00> : vector<1x128xf32>
    %25 = tpu.matmul %23, %3, %cst_25 {dimension_numbers = #tpu.dot_dimension_numbers<[1], [0], [0], [1], [0, 0, 1, 1], [], []>} : vector<1x128xf32>, vector<128x128xf32>, vector<1x128xf32> -> vector<1x128xf32>
    %26 = arith.mulf %24, %24 : vector<1x128xf32>
    %27 = arith.subf %25, %26 : vector<1x128xf32>
    %cst_26 = arith.constant 0.000000e+00 : f32
    %28 = vector.broadcast %cst_26 : f32 to vector<1x128xf32>
    %29 = arith.maximumf %27, %28 : vector<1x128xf32>
    %cst_27 = arith.constant 9.99999974E-6 : f32
    %30 = vector.broadcast %cst_27 : f32 to vector<1x128xf32>
    %31 = arith.addf %29, %30 : vector<1x128xf32>
    %32 = math.rsqrt %31 : vector<1x128xf32>
    %33 = arith.mulf %17, %32 : vector<1x128xf32>
    %34 = arith.mulf %24, %33 : vector<1x128xf32>
    %35 = arith.subf %18, %34 : vector<1x128xf32>
    %36 = vector.broadcast %33 : vector<1x128xf32> to vector<32x128xf32>
    %37 = arith.mulf %16, %36 : vector<32x128xf32>
    %38 = vector.broadcast %35 : vector<1x128xf32> to vector<32x128xf32>
    %39 = arith.addf %37, %38 : vector<32x128xf32>
    %cst_28 = arith.constant 0.000000e+00 : f32
    %40 = vector.broadcast %cst_28 : f32 to vector<32x128xf32>
    %41 = arith.maximumf %39, %40 : vector<32x128xf32>
    %c0_29 = arith.constant 0 : index
    %c0_30 = arith.constant 0 : index
    %c0_31 = arith.constant 0 : index
    %42 = vector.load %arg3[%c0_29, %c0_30, %c0_31] : memref<3x128x128xf32, #tpu.memory_space<vmem>>, vector<1x128x128xf32>
    %43 = vector.shape_cast %42 : vector<1x128x128xf32> to vector<128x128xf32>
    %cst_32 = arith.constant dense<0.000000e+00> : vector<32x128xf32>
    %44 = tpu.matmul %41, %43, %cst_32 {dimension_numbers = #tpu.dot_dimension_numbers<[1], [0], [0], [1], [0, 0, 1, 1], [], []>} : vector<32x128xf32>, vector<128x128xf32>, vector<32x128xf32> -> vector<32x128xf32>
    %c1_33 = arith.constant 1 : index
    %c0_34 = arith.constant 0 : index
    %c0_35 = arith.constant 0 : index
    %45 = vector.load %arg3[%c1_33, %c0_34, %c0_35] : memref<3x128x128xf32, #tpu.memory_space<vmem>>, vector<1x128x128xf32>
    %46 = vector.shape_cast %45 : vector<1x128x128xf32> to vector<128x128xf32>
    %cst_36 = arith.constant dense<0.000000e+00> : vector<32x128xf32>
    %47 = tpu.matmul %41, %46, %cst_36 {dimension_numbers = #tpu.dot_dimension_numbers<[1], [0], [0], [1], [0, 0, 1, 1], [], []>} : vector<32x128xf32>, vector<128x128xf32>, vector<32x128xf32> -> vector<32x128xf32>
    %c2_37 = arith.constant 2 : index
    %c0_38 = arith.constant 0 : index
    %c0_39 = arith.constant 0 : index
    %48 = vector.load %arg3[%c2_37, %c0_38, %c0_39] : memref<3x128x128xf32, #tpu.memory_space<vmem>>, vector<1x128x128xf32>
    %49 = vector.shape_cast %48 : vector<1x128x128xf32> to vector<128x128xf32>
    %cst_40 = arith.constant dense<0.000000e+00> : vector<32x128xf32>
    %50 = tpu.matmul %41, %49, %cst_40 {dimension_numbers = #tpu.dot_dimension_numbers<[1], [0], [0], [1], [0, 0, 1, 1], [], []>} : vector<32x128xf32>, vector<128x128xf32>, vector<32x128xf32> -> vector<32x128xf32>
    %cst_41 = arith.constant dense<0.000000e+00> : vector<32x128xf32>
    %51 = tpu.matmul %1, %44, %cst_41 {dimension_numbers = #tpu.dot_dimension_numbers<[1], [0], [0], [1], [0, 0, 1, 1], [], []>} : vector<32x32xf32>, vector<32x128xf32>, vector<32x128xf32> -> vector<32x128xf32>
    %52 = arith.addf %47, %51 : vector<32x128xf32>
    %cst_42 = arith.constant dense<0.000000e+00> : vector<32x128xf32>
    %53 = tpu.matmul %2, %50, %cst_42 {dimension_numbers = #tpu.dot_dimension_numbers<[1], [0], [0], [1], [0, 0, 1, 1], [], []>} : vector<32x32xf32>, vector<32x128xf32>, vector<32x128xf32> -> vector<32x128xf32>
    %54 = arith.addf %52, %53 : vector<32x128xf32>
    %c0_43 = arith.constant 0 : index
    %c0_44 = arith.constant 0 : index
    %55 = vector.load %arg9[%c0_43, %c0_44] : memref<1x128xf32, #tpu.memory_space<vmem>>, vector<1x128xf32>
    %c0_45 = arith.constant 0 : index
    %c0_46 = arith.constant 0 : index
    %56 = vector.load %arg10[%c0_45, %c0_46] : memref<1x128xf32, #tpu.memory_space<vmem>>, vector<1x128xf32>
    %cst_47 = arith.constant dense<0.000000e+00> : vector<128xf32>
    %57 = vector.multi_reduction <add>, %54, %cst_47 [0] : vector<32x128xf32> to vector<128xf32>
    %58 = vector.shape_cast %57 : vector<128xf32> to vector<1x128xf32>
    %59 = arith.mulf %54, %54 : vector<32x128xf32>
    %cst_48 = arith.constant dense<0.000000e+00> : vector<128xf32>
    %60 = vector.multi_reduction <add>, %59, %cst_48 [0] : vector<32x128xf32> to vector<128xf32>
    %61 = vector.shape_cast %60 : vector<128xf32> to vector<1x128xf32>
    %cst_49 = arith.constant dense<0.000000e+00> : vector<1x128xf32>
    %62 = tpu.matmul %58, %3, %cst_49 {dimension_numbers = #tpu.dot_dimension_numbers<[1], [0], [0], [1], [0, 0, 1, 1], [], []>} : vector<1x128xf32>, vector<128x128xf32>, vector<1x128xf32> -> vector<1x128xf32>
    %cst_50 = arith.constant dense<0.000000e+00> : vector<1x128xf32>
    %63 = tpu.matmul %61, %3, %cst_50 {dimension_numbers = #tpu.dot_dimension_numbers<[1], [0], [0], [1], [0, 0, 1, 1], [], []>} : vector<1x128xf32>, vector<128x128xf32>, vector<1x128xf32> -> vector<1x128xf32>
    %64 = arith.mulf %62, %62 : vector<1x128xf32>
    %65 = arith.subf %63, %64 : vector<1x128xf32>
    %cst_51 = arith.constant 0.000000e+00 : f32
    %66 = vector.broadcast %cst_51 : f32 to vector<1x128xf32>
    %67 = arith.maximumf %65, %66 : vector<1x128xf32>
    %cst_52 = arith.constant 9.99999974E-6 : f32
    %68 = vector.broadcast %cst_52 : f32 to vector<1x128xf32>
    %69 = arith.addf %67, %68 : vector<1x128xf32>
    %70 = math.rsqrt %69 : vector<1x128xf32>
    %71 = arith.mulf %55, %70 : vector<1x128xf32>
    %72 = arith.mulf %62, %71 : vector<1x128xf32>
    %73 = arith.subf %56, %72 : vector<1x128xf32>
    %74 = vector.broadcast %71 : vector<1x128xf32> to vector<32x128xf32>
    %75 = arith.mulf %54, %74 : vector<32x128xf32>
    %76 = vector.broadcast %73 : vector<1x128xf32> to vector<32x128xf32>
    %77 = arith.addf %75, %76 : vector<32x128xf32>
    %78 = arith.addf %77, %0 : vector<32x128xf32>
    %cst_53 = arith.constant 0.000000e+00 : f32
    %79 = vector.broadcast %cst_53 : f32 to vector<32x128xf32>
    %80 = arith.maximumf %78, %79 : vector<32x128xf32>
    %c0_54 = arith.constant 0 : index
    %c0_55 = arith.constant 0 : index
    %81 = vector.load %arg11[%c0_54, %c0_55] : memref<32x128xf32, #tpu.memory_space<vmem>>, vector<32x128xf32>
    tpu.vector_store %arg11[%c0_54, %c0_55], %80 {strides = array<i32>} : memref<32x128xf32, #tpu.memory_space<vmem>>, vector<32x128xf32>,
    return
  }
  func.func @transform_0(%arg0: i32) -> (i32, i32) {
    %c0_i32 = arith.constant 0 : i32
    %c0_i32_0 = arith.constant 0 : i32
    %c0_i32_1 = arith.constant 0 : i32
    return %c0_i32, %c0_i32_0 : i32, i32
  }
  func.func @transform_1(%arg0: i32) -> (i32, i32, i32) {
    %c0_i32 = arith.constant 0 : i32
    %c0_i32_0 = arith.constant 0 : i32
    %c0_i32_1 = arith.constant 0 : i32
    %c0_i32_2 = arith.constant 0 : i32
    return %c0_i32, %c0_i32_0, %c0_i32_1 : i32, i32, i32
  }
  func.func @transform_2(%arg0: i32) -> (i32, i32, i32) {
    %c0_i32 = arith.constant 0 : i32
    %c0_i32_0 = arith.constant 0 : i32
    %c0_i32_1 = arith.constant 0 : i32
    %c0_i32_2 = arith.constant 0 : i32
    return %c0_i32, %c0_i32_0, %c0_i32_1 : i32, i32, i32
  }
  func.func @transform_3(%arg0: i32) -> (i32, i32) {
    %c0_i32 = arith.constant 0 : i32
    %c0_i32_0 = arith.constant 0 : i32
    %c0_i32_1 = arith.constant 0 : i32
    return %c0_i32, %c0_i32_0 : i32, i32
  }
  func.func @transform_4(%arg0: i32) -> (i32, i32) {
    %c0_i32 = arith.constant 0 : i32
    %c0_i32_0 = arith.constant 0 : i32
    %c0_i32_1 = arith.constant 0 : i32
    return %c0_i32, %c0_i32_0 : i32, i32
  }
  func.func @transform_5(%arg0: i32) -> (i32, i32) {
    %c0_i32 = arith.constant 0 : i32
    %c0_i32_0 = arith.constant 0 : i32
    %c0_i32_1 = arith.constant 0 : i32
    return %c0_i32, %c0_i32_0 : i32, i32
  }
  func.func @transform_6(%arg0: i32) -> (i32, i32) {
    %c0_i32 = arith.constant 0 : i32
    %c0_i32_0 = arith.constant 0 : i32
    %c0_i32_1 = arith.constant 0 : i32
    return %c0_i32, %c0_i32_0 : i32, i32
  }
  func.func @transform_7(%arg0: i32) -> (i32, i32) {
    %c0_i32 = arith.constant 0 : i32
    %c0_i32_0 = arith.constant 0 : i32
    %c0_i32_1 = arith.constant 0 : i32
    return %c0_i32, %c0_i32_0 : i32, i32
  }
  func.func @transform_8(%arg0: i32) -> (i32, i32) {
    %c0_i32 = arith.constant 0 : i32
    %c0_i32_0 = arith.constant 0 : i32
    %c0_i32_1 = arith.constant 0 : i32
    return %c0_i32, %c0_i32_0 : i32, i32
  }
  func.func @transform_9(%arg0: i32) -> (i32, i32) {
    %c0_i32 = arith.constant 0 : i32
    %c0_i32_0 = arith.constant 0 : i32
    %c0_i32_1 = arith.constant 0 : i32
    return %c0_i32, %c0_i32_0 : i32, i32
  }
  func.func @transform_10(%arg0: i32) -> (i32, i32) {
    %c0_i32 = arith.constant 0 : i32
    %c0_i32_0 = arith.constant 0 : i32
    %c0_i32_1 = arith.constant 0 : i32
    return %c0_i32, %c0_i32_0 : i32, i32
  }
}

</mosaic_0001>

<bundles_post_ra>
// kernel: tile.33
= control target key start
LH: loop header
LB: loop body
LE: loop exit
PB: predicated region body
PF: predicated region fallthrough
CT: control target
= control target key end

     0   :  { %s28_s0 = inlined_call_operand.vmem [shape: f32[8], index: 0, kind: input, shape index: {}]   ;;  %s29_s1 = inlined_call_operand.vmem [shape: f32[16,8], index: 1, kind: output, shape index: {}]  }
   0x1   :  { %v4_v0 = vld [vmem:[%s28_s0] ss:$0 sm:$0xff] }
   0x2   :  { %5 = vst [vmem:[%s29_s1] sm:$0xff] %v4_v0  ;;  %8 = vst [vmem:[%s29_s1 + $0x8] sm:$0xff] %v4_v0 }

// kernel: tile.34
= control target key start
LH: loop header
LB: loop body
LE: loop exit
PB: predicated region body
PF: predicated region fallthrough
CT: control target
= control target key end

     0   :  { %s131_s10 = smov 120   ;;  %s132_s11 = smov 104   ;;  %vm3_vm0 = vcmask 64512   ;;  %vm9_vm1 = vcmask 1048512   ;;  %vm15_vm2 = vcmask 982912   ;;  %vm21_vm3 = vcmask 917312   ;;  %s207_s0 = inlined_call_operand.vmem [shape: f32[16,8], index: 0, kind: input, shape index: {}]   ;;  %s208_s1 = inlined_call_operand.vmem [shape: f32[1,128], index: 1, kind: output, shape index: {}]  }
   0x1   :  { %v101_v0 = vld [vmem:[%s207_s0 + $0xf] sm:$0x1]   ;;  %v103_v1 = vld [vmem:[%s207_s0 + $0xd] sm:$0x1]   ;;  %v102_v2 = vld [vmem:[%s207_s0 + $0xe] sm:$0x1]  }
   0x2   :  { %7 = vrot.lane.b32.xlu0 %v101_v0, %s131_s10  ;;  %19 = vrot.lane.b32.xlu1 %v103_v1, %s132_s11  ;;  %v104_v3 = vld [vmem:[%s207_s0 + $0xc] sm:$0x1]   ;;  %s133_s16 = smov 112   ;;  %s134_s17 = smov 96   ;;  %v105_v4 = vld [vmem:[%s207_s0 + $0xb] sm:$0x1]  }
   0x3   :  { %v106_v5 = vld [vmem:[%s207_s0 + $0xa] sm:$0x1]   ;;  %v2_v6 = vld [vmem:[%s207_s0] sm:$0x1]   ;;  %s135_s24 = smov 88   ;;  %s136_s25 = smov 80  }
   0x4   :  { %4 = vst.msk [vmem:[#allocation0] sm:$0x1] %vm3_vm0, %v2_v6   ;;  %v107_v7 = vld [vmem:[%s207_s0 + $0x9] sm:$0x1]   ;;  %v108_v8 = vld [vmem:[%s207_s0 + $0x8] sm:$0x1]  }
   0x5   :  { %s137_s30 = smov 72   ;;  %s138_s2 = smov 64   ;;  %v109_v9 = vld [vmem:[%s207_s0 + $0x7] sm:$0x1]   ;;  %v110_v10 = vld [vmem:[%s207_s0 + $0x6] sm:$0x1]  }
   0x6   :  { %13 = vrot.lane.b32.xlu0 %v102_v2, %s133_s16  ;;  %25 = vrot.lane.b32.xlu1 %v104_v3, %s134_s17  ;;  %s139_s7 = smov 56   ;;  %s140_s8 = smov 48   ;;  %v111_v11 = vld [vmem:[%s207_s0 + $0x5] sm:$0x1]   ;;  %v112_v12 = vld [vmem:[%s207_s0 + $0x4] sm:$0x1]  }
   0x7   :  { %s141_s13 = smov 40   ;;  %s142_s14 = smov 32   ;;  %v113_v13 = vld [vmem:[%s207_s0 + $0x3] sm:$0x1]   ;;  %v114_v14 = vld [vmem:[%s207_s0 + $0x2] sm:$0x1]  }
   0x8   :  { %s143_s19 = smov 24   ;;  %s144_s20 = smov 16   ;;  %v115_v15 = vld [vmem:[%s207_s0 + $0x1] sm:$0x1]   ;;  %vm27_vm4 = vcmask 851712   ;;  %vm33_vm5 = vcmask 786112  }
   0x9   :  { %s145_s0 = smov 8   ;;  %vm39_vm6 = vcmask 720512   ;;  %vm45_vm7 = vcmask 654912   ;;  %vm51_vm8 = vcmask 589312   ;;  %vm57_vm9 = vcmask 523712  }
   0xa   :  { %31 = vrot.lane.b32.xlu0 %v105_v4, %s135_s24  ;;  %37 = vrot.lane.b32.xlu1 %v106_v5, %s136_s25  ;;  %vm63_vm10 = vcmask 458112   ;;  %vm69_vm11 = vcmask 392512   ;;  %vm75_vm12 = vcmask 326912   ;;  %vm81_vm13 = vcmask 261312  }
   0xb   :  { %vm87_vm14 = vcmask 195712   ;;  %vm93_vm15 = vcmask 130112  }
   0xe   :  { %43 = vrot.lane.b32.xlu0 %v107_v7, %s137_s30  ;;  %49 = vrot.lane.b32.xlu1 %v108_v8, %s138_s2 }
  0x12   :  { %55 = vrot.lane.b32.xlu0 %v109_v9, %s139_s7  ;;  %61 = vrot.lane.b32.xlu1 %v110_v10, %s140_s8 }
  0x16   :  { %67 = vrot.lane.b32.xlu0 %v111_v11, %s141_s13  ;;  %73 = vrot.lane.b32.xlu1 %v112_v12, %s142_s14 }
  0x1a   :  { %79 = vrot.lane.b32.xlu0 %v113_v13, %s143_s19  ;;  %85 = vrot.lane.b32.xlu1 %v114_v14, %s144_s20 }
  0x1e   :  { %91 = vrot.lane.b32.xlu0 %v115_v15, %s145_s0 }
  0x74   :  { %v8_v16 = vpop.permute.xlu0 %7   ;;  %v20_v17 = vpop.permute.xlu1 %19  }
  0x75   :  { %10 = vst.msk [vmem:[#allocation0] sm:$0x1] %vm9_vm1, %v8_v16  }
  0x78   :  { %v14_v18 = vpop.permute.xlu0 %13   ;;  %v26_v19 = vpop.permute.xlu1 %25  }
  0x79   :  { %16 = vst.msk [vmem:[#allocation0] sm:$0x1] %vm15_vm2, %v14_v18  }
  0x7a   :  { %22 = vst.msk [vmem:[#allocation0] sm:$0x1] %vm21_vm3, %v20_v17  }
  0x7b   :  { %28 = vst.msk [vmem:[#allocation0] sm:$0x1] %vm27_vm4, %v26_v19  }
  0x7c   :  { %v32_v20 = vpop.permute.xlu0 %31   ;;  %v38_v21 = vpop.permute.xlu1 %37  }
  0x7d   :  { %34 = vst.msk [vmem:[#allocation0] sm:$0x1] %vm33_vm5, %v32_v20  }
  0x7e   :  { %40 = vst.msk [vmem:[#allocation0] sm:$0x1] %vm39_vm6, %v38_v21  }
  0x80   :  { %v44_v22 = vpop.permute.xlu0 %43   ;;  %v50_v23 = vpop.permute.xlu1 %49  }
  0x81   :  { %46 = vst.msk [vmem:[#allocation0] sm:$0x1] %vm45_vm7, %v44_v22  }
  0x82   :  { %52 = vst.msk [vmem:[#allocation0] sm:$0x1] %vm51_vm8, %v50_v23  }
  0x84   :  { %v56_v24 = vpop.permute.xlu0 %55   ;;  %v62_v25 = vpop.permute.xlu1 %61  }
  0x85   :  { %58 = vst.msk [vmem:[#allocation0] sm:$0x1] %vm57_vm9, %v56_v24  }
  0x86   :  { %64 = vst.msk [vmem:[#allocation0] sm:$0x1] %vm63_vm10, %v62_v25  }
  0x88   :  { %v68_v26 = vpop.permute.xlu0 %67   ;;  %v74_v27 = vpop.permute.xlu1 %73  }
  0x89   :  { %70 = vst.msk [vmem:[#allocation0] sm:$0x1] %vm69_vm11, %v68_v26  }
  0x8a   :  { %76 = vst.msk [vmem:[#allocation0] sm:$0x1] %vm75_vm12, %v74_v27  }
  0x8c   :  { %v80_v28 = vpop.permute.xlu0 %79   ;;  %v86_v29 = vpop.permute.xlu1 %85  }
  0x8d   :  { %82 = vst.msk [vmem:[#allocation0] sm:$0x1] %vm81_vm13, %v80_v28  }
  0x8e   :  { %88 = vst.msk [vmem:[#allocation0] sm:$0x1] %vm87_vm14, %v86_v29  }
  0x90   :  { %v92_v30 = vpop.permute.xlu0 %91  }
  0x91   :  { %94 = vst.msk [vmem:[#allocation0] sm:$0x1] %vm93_vm15, %v92_v30  }
  0x98   :  { %v98_v31 = vld [vmem:[#allocation0] sm:$0x1] }
  0x99   :  { %100 = vst [vmem:[%s208_s1] sm:$0x1] %v98_v31 }

// kernel: residual_block_pallas.1
= control target key start
LH: loop header
LB: loop body
LE: loop exit
PB: predicated region body
PF: predicated region fallthrough
CT: control target
= control target key end

     0   :  { %vm283_vm0 = vcmask 261120   ;;  %vm2519_vm1 = vmmov 0   ;;  %s3179_s1 = inlined_call_operand.vmem [shape: f32[3,128,128], index: 1, kind: input, shape index: {}]   ;;  %s3180_s0 = inlined_call_operand.vmem [shape: f32[32,128], index: 0, kind: input, shape index: {}]   ;;  %s3181_s3 = inlined_call_operand.vmem [shape: f32[32,32], index: 3, kind: input, shape index: {}]   ;;  %s3182_s4 = inlined_call_operand.vmem [shape: f32[32,32], index: 4, kind: input, shape index: {}]   ;;  %s3183_s5 = inlined_call_operand.vmem [shape: f32[128,128], index: 5, kind: input, shape index: {}]   ;;  %s3184_s2 = inlined_call_operand.vmem [shape: f32[3,128,128], index: 2, kind: input, shape index: {}]   ;;  %s3185_s6 = inlined_call_operand.vmem [shape: f32[1,128], index: 6, kind: input, shape index: {}]   ;;  %s3186_s7 = inlined_call_operand.vmem [shape: f32[1,128], index: 7, kind: input, shape index: {}]   ;;  %s3187_s8 = inlined_call_operand.vmem [shape: f32[1,128], index: 8, kind: input, shape index: {}]   ;;  %s3188_s9 = inlined_call_operand.vmem [shape: f32[1,128], index: 9, kind: input, shape index: {}]   ;;  %s3189_s10 = inlined_call_operand.vmem [shape: f32[32,128], index: 10, kind: output, shape index: {}]  }
   0x1   :  { %v63_v0 = vld [vmem:[%s3179_s1] sm:$0xff]  ;;  %v64_v1 = vld [vmem:[%s3179_s1 + $0x8] sm:$0xff]  ;;  %v65_v2 = vld [vmem:[%s3179_s1 + $0x10] sm:$0xff] }
   0x2   :  { %v2174_v3 = vpack.c.bf16 %v64_v1, %v63_v0  ;;  %v66_v4 = vld [vmem:[%s3179_s1 + $0x18] sm:$0xff]  ;;  %v1466_v5 = vld [vmem:[%s3179_s1 + $0x100] sm:$0xff]  ;;  %v1467_v6 = vld [vmem:[%s3179_s1 + $0x108] sm:$0xff] }
   0x3   :  { %v2178_v7 = vpack.c.bf16 %v66_v4, %v65_v2  ;;  %v2206_v8 = vpack.c.bf16 %v1467_v6, %v1466_v5  ;;  %v67_v9 = vld [vmem:[%s3179_s1 + $0x20] sm:$0xff]  ;;  %v68_v10 = vld [vmem:[%s3179_s1 + $0x28] sm:$0xff]  ;;  %v1468_v11 = vld [vmem:[%s3179_s1 + $0x110] sm:$0xff] }
   0x4   :  { %2175 = vmatprep.subr.bf16.mxu0 %v2174_v3  ;;  %v1469_v12 = vld [vmem:[%s3179_s1 + $0x118] sm:$0xff]  ;;  %v1470_v14 = vld [vmem:[%s3179_s1 + $0x120] sm:$0xff]  ;;  %v1471_v15 = vld [vmem:[%s3179_s1 + $0x128] sm:$0xff]  ;;  %v2182_v16 = vpack.c.bf16 %v68_v10, %v67_v9 }
   0x5   :  { %2177 = vmatpush3.bf16.msra.mxu0 %v2174_v3  ;;  %2207 = vmatprep.subr.bf16.mxu1 %v2206_v8  ;;  %v2210_v13 = vpack.c.bf16 %v1469_v12, %v1468_v11  ;;  %v69_v17 = vld [vmem:[%s3179_s1 + $0x30] sm:$0xff]  ;;  %v70_v18 = vld [vmem:[%s3179_s1 + $0x38] sm:$0xff]  ;;  %v2214_v19 = vpack.c.bf16 %v1471_v15, %v1470_v14  ;;  %v2627_v23 = vld [vmem:[%s3180_s0] sm:$0xff] }
   0x6   :  { %2179 = vmatprep.subr.bf16.mxu0 %v2178_v7  ;;  %2209 = vmatpush3.bf16.msra.mxu1 %v2206_v8  ;;  %v1472_v20 = vld [vmem:[%s3179_s1 + $0x130] sm:$0xff]  ;;  %v1473_v21 = vld [vmem:[%s3179_s1 + $0x138] sm:$0xff]  ;;  %v2186_v22 = vpack.c.bf16 %v70_v18, %v69_v17  ;;  %v71_v24 = vld [vmem:[%s3179_s1 + $0x40] sm:$0xff] }
   0x7   :  { %2211 = vmatprep.subr.bf16.mxu1 %v2210_v13  ;;  %v72_v25 = vld [vmem:[%s3179_s1 + $0x48] sm:$0xff]  ;;  %v2218_v26 = vpack.c.bf16 %v1473_v21, %v1472_v20  ;;  %1782 = vmatprep.mubr.f32.mxu0 %v2627_v23  ;;  %v1474_v27 = vld [vmem:[%s3179_s1 + $0x140] sm:$0xff]  ;;  %v73_v30 = vld [vmem:[%s3179_s1 + $0x50] sm:$0xff] }
   0x8   :  { %v1475_v28 = vld [vmem:[%s3179_s1 + $0x148] sm:$0xff]  ;;  %1820 = vmatprep.mubr.f32.mxu1 %v2627_v23  ;;  %v2190_v29 = vpack.c.bf16 %v72_v25, %v71_v24  ;;  %v74_v31 = vld [vmem:[%s3179_s1 + $0x58] sm:$0xff]  ;;  %v1476_v33 = vld [vmem:[%s3179_s1 + $0x150] sm:$0xff] }
   0x9   :  { %2181 = vmatpush3.bf16.msra.mxu0 %v2178_v7  ;;  %v2222_v32 = vpack.c.bf16 %v1475_v28, %v1474_v27  ;;  %v1477_v34 = vld [vmem:[%s3179_s1 + $0x158] sm:$0xff]  ;;  %v2194_v35 = vpack.c.bf16 %v74_v31, %v73_v30  ;;  %v75_v36 = vld [vmem:[%s3179_s1 + $0x60] sm:$0xff]  ;;  %v76_v37 = vld [vmem:[%s3179_s1 + $0x68] sm:$0xff]  ;;  %v2518_v31 = vmov 0.0|0.0  }
   0xa   :  { %2183 = vmatprep.subr.bf16.mxu0 %v2182_v16  ;;  %2213 = vmatpush3.bf16.msra.mxu1 %v2210_v13  ;;  %v2226_v38 = vpack.c.bf16 %v1477_v34, %v1476_v33  ;;  %v1478_v39 = vld [vmem:[%s3179_s1 + $0x160] sm:$0xff]  ;;  %v1479_v40 = vld [vmem:[%s3179_s1 + $0x168] sm:$0xff]  ;;  %v2198_v41 = vpack.c.bf16 %v76_v37, %v75_v36  ;;  %v77_v42 = vld [vmem:[%s3179_s1 + $0x70] sm:$0xff] }
   0xb   :  { %2215 = vmatprep.subr.bf16.mxu1 %v2214_v19  ;;  %v78_v43 = vld [vmem:[%s3179_s1 + $0x78] sm:$0xff]  ;;  %v2230_v44 = vpack.c.bf16 %v1479_v40, %v1478_v39  ;;  %v1480_v45 = vld [vmem:[%s3179_s1 + $0x170] sm:$0xff]  ;;  %v1450_v49 = vld [vmem:[%s3179_s1 + $0x80] sm:$0xff] }
   0xc   :  { %v1481_v46 = vld [vmem:[%s3179_s1 + $0x178] sm:$0xff]  ;;  %v2202_v47 = vpack.c.bf16 %v78_v43, %v77_v42  ;;  %v1451_v50 = vld [vmem:[%s3179_s1 + $0x88] sm:$0xff]  ;;  %v1452_v52 = vld [vmem:[%s3179_s1 + $0x90] sm:$0xff] }
   0xd   :  { %2185 = vmatpush3.bf16.msra.mxu0 %v2182_v16  ;;  %v2234_v48 = vpack.c.bf16 %v1481_v46, %v1480_v45  ;;  %v2246_v51 = vpack.c.bf16 %v1451_v50, %v1450_v49  ;;  %v1453_v53 = vld [vmem:[%s3179_s1 + $0x98] sm:$0xff]  ;;  %v2694_v54 = vld [vmem:[%s3180_s0 + $0x8] sm:$0xff]  ;;  %v2699_v55 = vld [vmem:[%s3180_s0 + $0x10] sm:$0xff] }
   0xe   :  { %2187 = vmatprep.subr.bf16.mxu0 %v2186_v22  ;;  %2217 = vmatpush3.bf16.msra.mxu1 %v2214_v19  ;;  %v2250_v56 = vpack.c.bf16 %v1453_v53, %v1452_v52  ;;  %v1454_v57 = vld [vmem:[%s3179_s1 + $0xa0] sm:$0xff]  ;;  %v1455_v58 = vld [vmem:[%s3179_s1 + $0xa8] sm:$0xff]  ;;  %v2712_v59 = vld [vmem:[%s3180_s0 + $0x18] sm:$0xff] }
   0xf   :  { %2219 = vmatprep.subr.bf16.mxu1 %v2218_v26  ;;  %v2254_v60 = vpack.c.bf16 %v1455_v58, %v1454_v57  ;;  %v1456_v61 = vld [vmem:[%s3179_s1 + $0xb0] sm:$0xff]  ;;  %v1457_v62 = vld [vmem:[%s3179_s1 + $0xb8] sm:$0xff]  ;;  %v1458_v0 = vld [vmem:[%s3179_s1 + $0xc0] sm:$0xff] }
  0x10   :  { %v2258_v63 = vpack.c.bf16 %v1457_v62, %v1456_v61  ;;  %v1459_v1 = vld [vmem:[%s3179_s1 + $0xc8] sm:$0xff]  ;;  %v1460_v3 = vld [vmem:[%s3179_s1 + $0xd0] sm:$0xff]  ;;  %v1461_v4 = vld [vmem:[%s3179_s1 + $0xd8] sm:$0xff] }
  0x11   :  { %2189 = vmatpush3.bf16.msra.mxu0 %v2186_v22  ;;  %v2262_v2 = vpack.c.bf16 %v1459_v1, %v1458_v0  ;;  %v2266_v5 = vpack.c.bf16 %v1461_v4, %v1460_v3  ;;  %v1462_v6 = vld [vmem:[%s3179_s1 + $0xe0] sm:$0xff]  ;;  %v1463_v7 = vld [vmem:[%s3179_s1 + $0xe8] sm:$0xff]  ;;  %v1464_v9 = vld [vmem:[%s3179_s1 + $0xf0] sm:$0xff]  ;;  %v2520_v0 = vmov 0.0  }
  0x12   :  { %2191 = vmatprep.subr.bf16.mxu0 %v2190_v29  ;;  %2221 = vmatpush3.bf16.msra.mxu1 %v2218_v26  ;;  %v2270_v8 = vpack.c.bf16 %v1463_v7, %v1462_v6  ;;  %v1465_v10 = vld [vmem:[%s3179_s1 + $0xf8] sm:$0xff]  ;;  %v2752_v12 = vld [vmem:[%s3181_s3] sm:$0xff]  ;;  %v2762_v25 = vld [vmem:[%s3181_s3 + $0x8] sm:$0xff] }
  0x13   :  { %2223 = vmatprep.subr.bf16.mxu1 %v2222_v32  ;;  %v2274_v11 = vpack.c.bf16 %v1465_v10, %v1464_v9  ;;  %v2767_v26 = vld [vmem:[%s3181_s3 + $0x10] sm:$0xff]  ;;  %v2776_v27 = vld [vmem:[%s3181_s3 + $0x18] sm:$0xff]  ;;  %v2781_v28 = vld [vmem:[%s3182_s4] sm:$0xff] }
  0x14   :  { %v2795_v30 = vld [vmem:[%s3182_s4 + $0x10] sm:$0xff]  ;;  %v47_v33 = vld [vmem:[%s3183_s5] sm:$0xff]  ;;  %v48_v34 = vld [vmem:[%s3183_s5 + $0x8] sm:$0xff] }
  0x15   :  { %2193 = vmatpush3.bf16.msra.mxu0 %v2190_v29  ;;  %v2790_v29 = vld [vmem:[%s3182_s4 + $0x8] sm:$0xff]  ;;  %v50_v39 = vld [vmem:[%s3183_s5 + $0x18] sm:$0xff]  ;;  %v51_v43 = vld [vmem:[%s3183_s5 + $0x20] sm:$0xff] }
  0x16   :  { %2195 = vmatprep.subr.bf16.mxu0 %v2194_v35  ;;  %2225 = vmatpush3.bf16.msra.mxu1 %v2222_v32  ;;  %v2805_v32 = vld [vmem:[%s3182_s4 + $0x18] sm:$0xff]  ;;  %v53_v46 = vld [vmem:[%s3183_s5 + $0x30] sm:$0xff]  ;;  %v55_v49 = vld [vmem:[%s3183_s5 + $0x40] sm:$0xff] }
  0x17   :  { %2227 = vmatprep.subr.bf16.mxu1 %v2226_v38  ;;  %v56_v50 = vld [vmem:[%s3183_s5 + $0x48] sm:$0xff]  ;;  %v57_v52 = vld [vmem:[%s3183_s5 + $0x50] sm:$0xff]  ;;  %v58_v53 = vld [vmem:[%s3183_s5 + $0x58] sm:$0xff] }
  0x18   :  { %v59_v57 = vld [vmem:[%s3183_s5 + $0x60] sm:$0xff]  ;;  %v60_v58 = vld [vmem:[%s3183_s5 + $0x68] sm:$0xff]  ;;  %v61_v61 = vld [vmem:[%s3183_s5 + $0x70] sm:$0xff] }
  0x19   :  { %2197 = vmatpush3.bf16.msra.mxu0 %v2194_v35  ;;  %v2815_v35 = vpack.c.bf16 %v48_v34, %v47_v33  ;;  %v62_v62 = vld [vmem:[%s3183_s5 + $0x78] sm:$0xff] }
  0x1a   :  { %2199 = vmatprep.subr.bf16.mxu0 %v2198_v41  ;;  %2229 = vmatpush3.bf16.msra.mxu1 %v2226_v38  ;;  %v49_v38 = vld [vmem:[%s3183_s5 + $0x10] sm:$0xff] }
  0x1b   :  { %2231 = vmatprep.subr.bf16.mxu1 %v2230_v44  ;;  %v2825_v40 = vpack.c.bf16 %v50_v39, %v49_v38 }
  0x1d   :  { %2201 = vmatpush3.bf16.msra.mxu0 %v2198_v41 }
  0x1e   :  { %2203 = vmatprep.subr.bf16.mxu0 %v2202_v47  ;;  %2233 = vmatpush3.bf16.msra.mxu1 %v2230_v44  ;;  %v52_v44 = vld [vmem:[%s3183_s5 + $0x28] sm:$0xff] }
  0x1f   :  { %2235 = vmatprep.subr.bf16.mxu1 %v2234_v48  ;;  %v2835_v45 = vpack.c.bf16 %v52_v44, %v51_v43 }
  0x21   :  { %2205 = vmatpush3.bf16.msra.mxu0 %v2202_v47  ;;  %v54_v47 = vld [vmem:[%s3183_s5 + $0x38] sm:$0xff] }
  0x22   :  { %2237 = vmatpush3.bf16.msra.mxu1 %v2234_v48  ;;  %2247 = vmatprep.subr.bf16.mxu0 %v2246_v51  ;;  %v2845_v48 = vpack.c.bf16 %v54_v47, %v53_v46 }
  0x24   :  { %1783 = vmatmul.mubr.f32.vlgmr.msra.gmra.mrb[0].mxu0 %v2694_v54 }
  0x25   :  { %1785 = vmatprep.mubr.f32.mxu0 %v2699_v55  ;;  %1821 = vmatmul.mubr.f32.vlgmr.msra.gmra.mrb[0].mxu1 %v2694_v54 }
  0x26   :  { %1823 = vmatprep.mubr.f32.mxu1 %v2699_v55  ;;  %2249 = vmatpush3.bf16.msra.mxu0 %v2246_v51  ;;  %v2855_v51 = vpack.c.bf16 %v56_v50, %v55_v49 }
  0x27   :  { %2251 = vmatprep.subr.bf16.mxu0 %v2250_v56 }
  0x28   :  { %1786 = vmatmul.mubr.f32.gmra.mrb[2].mxu0 %v2712_v59 }
  0x29   :  { %1824 = vmatmul.mubr.f32.gmra.mrb[2].mxu1 %v2712_v59  ;;  %1872 = vmatprep.mubr.f32.mxu0 %v2627_v23 }
  0x2a   :  { %2253 = vmatpush3.bf16.msra.mxu0 %v2250_v56  ;;  %1834 = vmatprep.mubr.msk.f32.mxu1 %vm283_vm0, %v2752_v12  ;;  %v2865_v56 = vpack.c.bf16 %v58_v53, %v57_v52  ;;  %v763_v53 = vld [vmem:[%s3184_s2] sm:$0xff] }
  0x2b   :  { %2255 = vmatprep.subr.bf16.mxu0 %v2254_v60 }
  0x2e   :  { %2257 = vmatpush3.bf16.msra.mxu0 %v2254_v60  ;;  %v2875_v60 = vpack.c.bf16 %v60_v58, %v59_v57  ;;  %v764_v57 = vld [vmem:[%s3184_s2 + $0x8] sm:$0xff]  ;;  %v1506_v58 = vld [vmem:[%s3184_s2 + $0x100] sm:$0xff] }
  0x2f   :  { %2259 = vmatprep.subr.bf16.mxu0 %v2258_v63 }
  0x32   :  { %2261 = vmatpush3.bf16.msra.mxu0 %v2258_v63  ;;  %v2885_v63 = vpack.c.bf16 %v62_v62, %v61_v61  ;;  %v2334_v61 = vpack.c.bf16 %v764_v57, %v763_v53  ;;  %v1507_v62 = vld [vmem:[%s3184_s2 + $0x108] sm:$0xff] }
  0x33   :  { %2263 = vmatprep.subr.bf16.mxu0 %v2262_v2  ;;  %v1519_v57 = vld [vmem:[%s3184_s2 + $0x168] sm:$0xff] }
  0x36   :  { %2265 = vmatpush3.bf16.msra.mxu0 %v2262_v2 }
  0x37   :  { %2267 = vmatprep.subr.bf16.mxu0 %v2266_v5 }
  0x3a   :  { %2269 = vmatpush3.bf16.msra.mxu0 %v2266_v5 }
  0x3b   :  { %2271 = vmatprep.subr.bf16.mxu0 %v2270_v8 }
  0x3e   :  { %2273 = vmatpush3.bf16.msra.mxu0 %v2270_v8 }
  0x3f   :  { %2275 = vmatprep.subr.bf16.mxu0 %v2274_v11 }
  0x42   :  { %2277 = vmatpush3.bf16.msra.mxu0 %v2274_v11 }
  0x43   :  { %2335 = vmatprep.subr.bf16.mxu0 %v2334_v61 }
  0x45   :  { %1873 = vmatmul.mubr.f32.vlgmr.msra.gmra.mrb[4].mxu0 %v2694_v54 }
  0x46   :  { %1875 = vmatprep.mubr.f32.mxu0 %v2699_v55  ;;  %2337 = vmatpush3.bf16.msra.mxu0 %v2334_v61  ;;  %v778_v61 = vld [vmem:[%s3184_s2 + $0x78] sm:$0xff] }
  0x49   :  { %1876 = vmatmul.mubr.f32.gmra.mrb[6].mxu0 %v2712_v59 }
  0xf7   :  { %v1784_v13 = vpop.f32.mrb[0].mxu0 }
  0xf8   :  { %v145_v14 = vpop.f32.mrb[1].mxu0  ;;  %v1822_v15 = vpop.f32.mrb[0].mxu1 }
  0xf9   :  { %v2238_v16 = vpack.c.bf16 %v1784_v13, %v145_v14  ;;  %v264_v17 = vpop.f32.mrb[1].mxu1 }
  0xfa   :  { %v2278_v18 = vpack.c.bf16 %v1822_v15, %v264_v17 }
  0xfb   :  { %v1787_v19 = vpop.f32.mrb[2].mxu0  ;;  %2239 = vmatprep.subr.bf16.mxu1 %v2238_v16 }
  0xfc   :  { %v155_v20 = vpop.f32.mrb[3].mxu0  ;;  %2241 = vmatpush3.bf16.msra.mxu1 %v2238_v16  ;;  %v1825_v21 = vpop.f32.mrb[2].mxu1 }
  0xfd   :  { %v2242_v22 = vpack.c.bf16 %v1787_v19, %v155_v20  ;;  %v274_v23 = vpop.f32.mrb[3].mxu1 }
  0xfe   :  { %v2282_v24 = vpack.c.bf16 %v1825_v21, %v274_v23 }
  0xff   :  { %2243 = vmatprep.subr.bf16.mxu1 %v2242_v22 }
 0x100   :  { %2245 = vmatpush3.bf16.msra.mxu1 %v2242_v22 }
 0x101   :  { %2279 = vmatprep.subr.bf16.mxu1 %v2278_v18 }
 0x103   :  { %1835 = vmatmul.mubr.msk.f32.vlgmr.msra.gmra.mrb[4].mxu1 %vm283_vm0, %v2762_v25 }
 0x104   :  { %2281 = vmatpush3.bf16.msra.mxu1 %v2278_v18  ;;  %1837 = vmatprep.mubr.msk.f32.mxu1 %vm283_vm0, %v2767_v26 }
 0x105   :  { %2283 = vmatprep.subr.bf16.mxu1 %v2282_v24 }
 0x107   :  { %1838 = vmatmul.mubr.msk.f32.gmra.mrb[6].mxu1 %vm283_vm0, %v2776_v27 }
 0x108   :  { %2285 = vmatpush3.bf16.msra.mxu1 %v2282_v24  ;;  %1886 = vmatprep.mubr.msk.f32.mxu1 %vm283_vm0, %v2781_v28 }
 0x109   :  { %2286 = vmatprep.subr.bf16.mxu1 %v2518_v31 }
 0x10b   :  { %1887 = vmatmul.mubr.msk.f32.vlgmr.msra.gmra.mrb[8].mxu1 %vm283_vm0, %v2790_v29 }
 0x10c   :  { %1889 = vmatprep.mubr.msk.f32.mxu1 %vm283_vm0, %v2795_v30  ;;  %2288 = vmatpush3.bf16.msra.mxu1 %v2815_v35 }
 0x10d   :  { %2289 = vmatprep.subr.bf16.mxu1 %v2518_v31 }
 0x10f   :  { %1890 = vmatmul.mubr.msk.f32.gmra.mrb[10].mxu1 %vm283_vm0, %v2805_v32 }
 0x110   :  { %2291 = vmatpush3.bf16.msra.mxu1 %v2825_v40  ;;  %1924 = vmatprep.mubr.msk.f32.mxu1 %vm2519_vm1, %v2520_v0 }
 0x111   :  { %2292 = vmatprep.subr.bf16.mxu1 %v2518_v31 }
 0x114   :  { %2294 = vmatpush3.bf16.msra.mxu1 %v2835_v45 }
 0x115   :  { %2295 = vmatprep.subr.bf16.mxu1 %v2518_v31 }
 0x118   :  { %v1874_v36 = vpop.f32.mrb[4].mxu0  ;;  %2297 = vmatpush3.bf16.msra.mxu1 %v2845_v48 }
 0x119   :  { %v447_v37 = vpop.f32.mrb[5].mxu0  ;;  %2298 = vmatprep.subr.bf16.mxu1 %v2518_v31 }
 0x11c   :  { %v1877_v41 = vpop.f32.mrb[6].mxu0  ;;  %2300 = vmatpush3.bf16.msra.mxu1 %v2855_v51 }
 0x11d   :  { %v457_v42 = vpop.f32.mrb[7].mxu0  ;;  %2301 = vmatprep.subr.bf16.mxu1 %v2518_v31 }
 0x120   :  { %2303 = vmatpush3.bf16.msra.mxu1 %v2865_v56 }
 0x121   :  { %2304 = vmatprep.subr.bf16.mxu1 %v2518_v31 }
 0x124   :  { %2306 = vmatpush3.bf16.msra.mxu1 %v2875_v60 }
 0x125   :  { %2307 = vmatprep.subr.bf16.mxu1 %v2518_v31 }
 0x128   :  { %2309 = vmatpush3.bf16.msra.mxu1 %v2885_v63 }
 0x129   :  { %2310 = vmatprep.subr.bf16.mxu1 %v2518_v31 }
 0x1d6   :  { %v1836_v1 = vpop.f32.mrb[4].mxu1 }
 0x1d7   :  { %v453_v2 = vadd.f32 %v1874_v36, %v1836_v1  ;;  %v362_v3 = vpop.f32.mrb[5].mxu1  ;;  %v2366_v1 = vpack.c.bf16 %v1507_v62, %v1506_v58  ;;  %v777_v58 = vld [vmem:[%s3184_s2 + $0x70] sm:$0xff] }
 0x1d8   :  { %v448_v4 = vadd.f32 %v447_v37, %v362_v3  ;;  %v766_v3 = vld [vmem:[%s3184_s2 + $0x18] sm:$0xff] }
 0x1da   :  { %v1839_v5 = vpop.f32.mrb[6].mxu1 }
 0x1db   :  { %v463_v6 = vadd.f32 %v1877_v41, %v1839_v5  ;;  %v372_v7 = vpop.f32.mrb[7].mxu1 }
 0x1dc   :  { %v458_v8 = vadd.f32 %v457_v42, %v372_v7 }
 0x1de   :  { %v1888_v9 = vpop.f32.mrb[8].mxu1 }
 0x1df   :  { %v2891_v10 = vadd.f32 %v1888_v9, %v453_v2  ;;  %v544_v11 = vpop.f32.mrb[9].mxu1  ;;  %v765_v2 = vld [vmem:[%s3184_s2 + $0x10] sm:$0xff]  ;;  %v768_v9 = vld [vmem:[%s3184_s2 + $0x28] sm:$0xff] }
 0x1e0   :  { %v2893_v13 = vadd.f32 %v544_v11, %v448_v4  ;;  %v1508_v4 = vld [vmem:[%s3184_s2 + $0x110] sm:$0xff]  ;;  %v2338_v5 = vpack.c.bf16 %v766_v3, %v765_v2  ;;  %v1510_v11 = vld [vmem:[%s3184_s2 + $0x120] sm:$0xff]  ;;  %v1521_v3 = vld [vmem:[%s3184_s2 + $0x178] sm:$0xff] }
 0x1e1   :  { %v579_v33 = vmul.f32 %v2891_v10, %v2891_v10  ;;  %v1520_v2 = vld [vmem:[%s3184_s2 + $0x170] sm:$0xff] }
 0x1e2   :  { %v1891_v14 = vpop.f32.mrb[10].mxu1  ;;  %v569_v17 = vadd.f32 %v2891_v10, %v2893_v13  ;;  %v578_v34 = vmul.f32 %v2893_v13, %v2893_v13  ;;  %2339 = vmatprep.subr.bf16.mxu0 %v2338_v5 }
 0x1e3   :  { %v2895_v15 = vadd.f32 %v1891_v14, %v463_v6  ;;  %v554_v16 = vpop.f32.mrb[11].mxu1  ;;  %v1509_v6 = vld [vmem:[%s3184_s2 + $0x118] sm:$0xff]  ;;  %2341 = vmatpush3.bf16.msra.mxu0 %v2338_v5 }
 0x1e4   :  { %v2899_v18 = vadd.f32 %v554_v16, %v458_v8  ;;  %v582_v39 = vadd.f32 %v579_v33, %v578_v34  ;;  %v2370_v7 = vpack.c.bf16 %v1509_v6, %v1508_v4  ;;  %v767_v8 = vld [vmem:[%s3184_s2 + $0x20] sm:$0xff]  ;;  %v1511_v16 = vld [vmem:[%s3184_s2 + $0x128] sm:$0xff]  ;;  %v2394_v4 = vpack.c.bf16 %v1521_v3, %v1520_v2 }
 0x1e5   :  { %v581_v42 = vmul.f32 %v2895_v15, %v2895_v15  ;;  %v2342_v14 = vpack.c.bf16 %v768_v9, %v767_v8  ;;  %v771_v33 = vld [vmem:[%s3184_s2 + $0x40] sm:$0xff]  ;;  %v772_v34 = vld [vmem:[%s3184_s2 + $0x48] sm:$0xff] }
 0x1e6   :  { %v570_v19 = vadd.f32 %v569_v17, %v2899_v18  ;;  %v580_v37 = vmul.f32 %v2899_v18, %v2899_v18  ;;  %v2374_v17 = vpack.c.bf16 %v1511_v16, %v1510_v11 }
 0x1e7   :  { %2343 = vmatprep.subr.bf16.mxu0 %v2342_v14 }
 0x1e8   :  { %v571_v20 = vadd.f32 %v570_v19, %v2895_v15  ;;  %v583_v41 = vadd.f32 %v582_v39, %v580_v37  ;;  %2345 = vmatpush3.bf16.msra.mxu0 %v2342_v14  ;;  %v769_v19 = vld [vmem:[%s3184_s2 + $0x30] sm:$0xff]  ;;  %v2350_v37 = vpack.c.bf16 %v772_v34, %v771_v33 }
 0x1ea   :  { %v572_v21 = vrot.slane %v571_v20, 4  ;;  %v584_v43 = vadd.f32 %v583_v41, %v581_v42  ;;  %v773_v41 = vld [vmem:[%s3184_s2 + $0x50] sm:$0xff]  ;;  %v774_v42 = vld [vmem:[%s3184_s2 + $0x58] sm:$0xff] }
 0x1ec   :  { %v573_v22 = vadd.f32 %v572_v21, %v571_v20  ;;  %v585_v44 = vrot.slane %v584_v43, 4  ;;  %v770_v20 = vld [vmem:[%s3184_s2 + $0x38] sm:$0xff]  ;;  %v1512_v21 = vld [vmem:[%s3184_s2 + $0x130] sm:$0xff] }
 0x1ee   :  { %v574_v23 = vrot.slane %v573_v22, 2  ;;  %v586_v46 = vadd.f32 %v585_v44, %v584_v43  ;;  %v1516_v43 = vld [vmem:[%s3184_s2 + $0x150] sm:$0xff]  ;;  %v2354_v44 = vpack.c.bf16 %v774_v42, %v773_v41 }
 0x1f0   :  { %v575_v24 = vadd.f32 %v574_v23, %v573_v22  ;;  %v587_v47 = vrot.slane %v586_v46, 2  ;;  %v2346_v22 = vpack.c.bf16 %v770_v20, %v769_v19  ;;  %v1513_v23 = vld [vmem:[%s3184_s2 + $0x138] sm:$0xff]  ;;  %v567_v20 = vld [vmem:[%s3185_s6] sm:$0x1] }
 0x1f2   :  { %v576_v36 = vrot.slane %v575_v24, 1  ;;  %v588_v49 = vadd.f32 %v587_v47, %v586_v46  ;;  %2347 = vmatprep.subr.bf16.mxu0 %v2346_v22  ;;  %v1517_v46 = vld [vmem:[%s3184_s2 + $0x158] sm:$0xff] }
 0x1f3   :  { %2349 = vmatpush3.bf16.msra.mxu0 %v2346_v22  ;;  %v2386_v47 = vpack.c.bf16 %v1517_v46, %v1516_v43 }
 0x1f4   :  { %v577_v38 = vadd.f32 %v576_v36, %v575_v24  ;;  %v589_v50 = vrot.slane %v588_v49, 1  ;;  %v2378_v24 = vpack.c.bf16 %v1513_v23, %v1512_v21  ;;  %v1514_v36 = vld [vmem:[%s3184_s2 + $0x140] sm:$0xff]  ;;  %2351 = vmatprep.subr.bf16.mxu0 %v2350_v37 }
 0x1f6   :  { %1925 = vmatmul.mubr.f32.vlgmr.msra.gmra.mrb[12].mxu1 %v577_v38  ;;  %v590_v52 = vadd.f32 %v589_v50, %v588_v49  ;;  %v1515_v38 = vld [vmem:[%s3184_s2 + $0x148] sm:$0xff]  ;;  %v775_v49 = vld [vmem:[%s3184_s2 + $0x60] sm:$0xff] }
 0x1f7   :  { %2312 = vmatpush3.bf16.msra.mxu1 %v2815_v35  ;;  %1959 = vmatprep.mubr.msk.f32.mxu1 %vm2519_vm1, %v2520_v0  ;;  %v2382_v39 = vpack.c.bf16 %v1515_v38, %v1514_v36  ;;  %v776_v50 = vld [vmem:[%s3184_s2 + $0x68] sm:$0xff] }
 0x1f8   :  { %2313 = vmatprep.subr.bf16.mxu1 %v2518_v31  ;;  %2353 = vmatpush3.bf16.msra.mxu0 %v2350_v37  ;;  %v2358_v53 = vpack.c.bf16 %v776_v50, %v775_v49 }
 0x1f9   :  { %2355 = vmatprep.subr.bf16.mxu0 %v2354_v44 }
 0x1fb   :  { %2315 = vmatpush3.bf16.msra.mxu1 %v2825_v40 }
 0x1fc   :  { %2316 = vmatprep.subr.bf16.mxu1 %v2518_v31  ;;  %2357 = vmatpush3.bf16.msra.mxu0 %v2354_v44 }
 0x1fd   :  { %2359 = vmatprep.subr.bf16.mxu0 %v2358_v53 }
 0x1ff   :  { %2318 = vmatpush3.bf16.msra.mxu1 %v2835_v45 }
 0x200   :  { %2319 = vmatprep.subr.bf16.mxu1 %v2518_v31  ;;  %2361 = vmatpush3.bf16.msra.mxu0 %v2358_v53 }
 0x203   :  { %2321 = vmatpush3.bf16.msra.mxu1 %v2845_v48 }
 0x204   :  { %2322 = vmatprep.subr.bf16.mxu1 %v2518_v31 }
 0x207   :  { %2324 = vmatpush3.bf16.msra.mxu1 %v2855_v51 }
 0x208   :  { %2325 = vmatprep.subr.bf16.mxu1 %v2518_v31 }
 0x20b   :  { %2327 = vmatpush3.bf16.msra.mxu1 %v2865_v56 }
 0x20c   :  { %2328 = vmatprep.subr.bf16.mxu1 %v2518_v31 }
 0x20f   :  { %2330 = vmatpush3.bf16.msra.mxu1 %v2875_v60 }
 0x210   :  { %2331 = vmatprep.subr.bf16.mxu1 %v2518_v31 }
 0x213   :  { %2333 = vmatpush3.bf16.msra.mxu1 %v2885_v63 }
 0x214   :  { %2367 = vmatprep.subr.bf16.mxu1 %v2366_v1 }
 0x216   :  { %1960 = vmatmul.mubr.f32.vlgmr.msra.gmra.mrb[14].mxu1 %v590_v52  ;;  %v1518_v52 = vld [vmem:[%s3184_s2 + $0x160] sm:$0xff] }
 0x217   :  { %2369 = vmatpush3.bf16.msra.mxu1 %v2366_v1  ;;  %v2390_v62 = vpack.c.bf16 %v1519_v57, %v1518_v52  ;;  %v2362_v1 = vpack.c.bf16 %v778_v61, %v777_v58  ;;  %v1490_v58 = vld [vmem:[%s3184_s2 + $0x80] sm:$0xff]  ;;  %v1491_v61 = vld [vmem:[%s3184_s2 + $0x88] sm:$0xff] }
 0x218   :  { %2371 = vmatprep.subr.bf16.mxu1 %v2370_v7 }
 0x219   :  { %2363 = vmatprep.subr.bf16.mxu0 %v2362_v1 }
 0x21a   :  { %2365 = vmatpush3.bf16.msra.mxu0 %v2362_v1 }
 0x21b   :  { %2373 = vmatpush3.bf16.msra.mxu1 %v2370_v7 }
 0x21c   :  { %2375 = vmatprep.subr.bf16.mxu1 %v2374_v17 }
 0x21f   :  { %2377 = vmatpush3.bf16.msra.mxu1 %v2374_v17  ;;  %v740_v17 = vlaneseq }
 0x220   :  { %2379 = vmatprep.subr.bf16.mxu1 %v2378_v24 }
 0x221   :  { %v741_v19 = vshrl.u32 %v740_v17, 7  ;;  %v1496_v17 = vld [vmem:[%s3184_s2 + $0xb0] sm:$0xff] }
 0x223   :  { %2381 = vmatpush3.bf16.msra.mxu1 %v2378_v24  ;;  %v3028_v21 = vsub.s32 0, %v741_v19  ;;  %v568_v24 = vld [vmem:[%s3186_s7] sm:$0x1]  ;;  %v1497_v19 = vld [vmem:[%s3184_s2 + $0xb8] sm:$0xff] }
 0x224   :  { %2383 = vmatprep.subr.bf16.mxu1 %v2382_v39 }
 0x227   :  { %2385 = vmatpush3.bf16.msra.mxu1 %v2382_v39 }
 0x228   :  { %2387 = vmatprep.subr.bf16.mxu1 %v2386_v47 }
 0x22b   :  { %2389 = vmatpush3.bf16.msra.mxu1 %v2386_v47 }
 0x22c   :  { %2391 = vmatprep.subr.bf16.mxu1 %v2390_v62 }
 0x22f   :  { %2393 = vmatpush3.bf16.msra.mxu1 %v2390_v62 }
 0x230   :  { %2395 = vmatprep.subr.bf16.mxu1 %v2394_v4 }
 0x233   :  { %2397 = vmatpush3.bf16.msra.mxu1 %v2394_v4 }
 0x234   :  { %2446 = vmatprep.subr.bf16.mxu1 %v2518_v31 }
 0x2c9   :  { %v657_v5 = vpop.f32.mrb[12].mxu1 }
 0x2ca   :  { %v1926_v6 = vpop.f32.mrb[13].mxu1  ;;  %v731_v7 = vmul.f32 %v657_v5, %v657_v5 }
 0x2cb   :  { %v2406_v6 = vpack.c.bf16 %v1491_v61, %v1490_v58 }
 0x2e9   :  { %v727_v8 = vpop.f32.mrb[14].mxu1 }
 0x2ea   :  { %v732_v9 = vsub.f32 %v727_v8, %v731_v7  ;;  %v1961_v11 = vpop.f32.mrb[15].mxu1  ;;  %v1492_v7 = vld [vmem:[%s3184_s2 + $0x90] sm:$0xff]  ;;  %v1493_v8 = vld [vmem:[%s3184_s2 + $0x98] sm:$0xff] }
 0x2eb   :  { %v1494_v11 = vld [vmem:[%s3184_s2 + $0xa0] sm:$0xff] }
 0x2ec   :  { %v733_v14 = vmax.f32 %v732_v9, 0.0  ;;  %v2410_v9 = vpack.c.bf16 %v1493_v8, %v1492_v7 }
 0x2ee   :  { %v734_v16 = vadd.f32 1e-05, %v733_v14  ;;  %v1495_v14 = vld [vmem:[%s3184_s2 + $0xa8] sm:$0xff] }
 0x2f0   :  { %2513 = vrsqrt.f32 %v734_v16  ;;  %v2414_v16 = vpack.c.bf16 %v1495_v14, %v1494_v11 }
 0x2fa   :  { %v2514_v22 = vpop.eup %2513 }
 0x2fb   :  { %v736_v23 = vmul.f32 %v2514_v22, %v567_v20  ;;  %v1499_v20 = vld [vmem:[%s3184_s2 + $0xc8] sm:$0xff] }
 0x2fd   :  { %v737_v33 = vmul.f32 %v736_v23, %v657_v5  ;;  %v743_v34 = vrot.slane %v736_v23, %v3028_v21  ;;  %v1500_v23 = vld [vmem:[%s3184_s2 + $0xd0] sm:$0xff] }
 0x2ff   :  { %v738_v36 = vsub.f32 %v568_v24, %v737_v33  ;;  %v745_v37 = vmul.f32 %v743_v34, %v2893_v13  ;;  %v746_v39 = vmul.f32 %v743_v34, %v2891_v10  ;;  %v747_v41 = vmul.f32 %v743_v34, %v2899_v18  ;;  %v1502_v33 = vld [vmem:[%s3184_s2 + $0xe0] sm:$0xff] }
 0x300   :  { %v748_v42 = vmul.f32 %v743_v34, %v2895_v15  ;;  %v1503_v34 = vld [vmem:[%s3184_s2 + $0xe8] sm:$0xff] }
 0x301   :  { %v753_v38 = vrot.slane %v738_v36, %v3028_v21  ;;  %v2430_v36 = vpack.c.bf16 %v1503_v34, %v1502_v33 }
 0x303   :  { %v755_v43 = vadd.f32 %v753_v38, %v745_v37  ;;  %v756_v44 = vadd.f32 %v753_v38, %v746_v39  ;;  %v757_v46 = vadd.f32 %v753_v38, %v747_v41  ;;  %v758_v47 = vadd.f32 %v753_v38, %v748_v42  ;;  %v1504_v37 = vld [vmem:[%s3184_s2 + $0xf0] sm:$0xff]  ;;  %v1505_v38 = vld [vmem:[%s3184_s2 + $0xf8] sm:$0xff] }
 0x304   :  { %v2434_v39 = vpack.c.bf16 %v1505_v38, %v1504_v37 }
 0x305   :  { %v759_v49 = vmax.f32 %v755_v43, 0.0  ;;  %v3039_v50 = vmax.f32 %v756_v44, 0.0  ;;  %v3041_v52 = vmax.f32 %v757_v46, 0.0  ;;  %v3047_v10 = vmax.f32 %v758_v47, 0.0 }
 0x307   :  { %1994 = vmatprep.mubr.f32.mxu0 %v759_v49  ;;  %2032 = vmatprep.mubr.f32.mxu1 %v759_v49 }
 0x308   :  { %1995 = vmatmul.mubr.f32.vlgmr.msra.gmra.mrb[8].mxu0 %v3039_v50  ;;  %2033 = vmatmul.mubr.f32.vlgmr.msra.gmra.mrb[16].mxu1 %v3039_v50 }
 0x309   :  { %1997 = vmatprep.mubr.f32.mxu0 %v3041_v52  ;;  %2035 = vmatprep.mubr.f32.mxu1 %v3041_v52 }
 0x30a   :  { %2448 = vmatpush3.bf16.msra.mxu1 %v2815_v35 }
 0x30b   :  { %2449 = vmatprep.subr.bf16.mxu1 %v2518_v31 }
 0x30c   :  { %1998 = vmatmul.mubr.f32.gmra.mrb[10].mxu0 %v3047_v10  ;;  %2036 = vmatmul.mubr.f32.gmra.mrb[18].mxu1 %v3047_v10 }
 0x30d   :  { %2046 = vmatprep.mubr.msk.f32.mxu0 %vm283_vm0, %v2752_v12  ;;  %2136 = vmatprep.mubr.msk.f32.mxu1 %vm2519_vm1, %v2520_v0 }
 0x30e   :  { %2451 = vmatpush3.bf16.msra.mxu1 %v2825_v40 }
 0x30f   :  { %2452 = vmatprep.subr.bf16.mxu1 %v2518_v31 }
 0x312   :  { %2454 = vmatpush3.bf16.msra.mxu1 %v2835_v45 }
 0x313   :  { %2455 = vmatprep.subr.bf16.mxu1 %v2518_v31 }
 0x316   :  { %2457 = vmatpush3.bf16.msra.mxu1 %v2845_v48 }
 0x317   :  { %2458 = vmatprep.subr.bf16.mxu1 %v2518_v31 }
 0x31a   :  { %2460 = vmatpush3.bf16.msra.mxu1 %v2855_v51 }
 0x31b   :  { %2461 = vmatprep.subr.bf16.mxu1 %v2518_v31 }
 0x31e   :  { %2463 = vmatpush3.bf16.msra.mxu1 %v2865_v56 }
 0x31f   :  { %2464 = vmatprep.subr.bf16.mxu1 %v2518_v31 }
 0x322   :  { %2466 = vmatpush3.bf16.msra.mxu1 %v2875_v60 }
 0x323   :  { %2467 = vmatprep.subr.bf16.mxu1 %v2518_v31 }
 0x326   :  { %2469 = vmatpush3.bf16.msra.mxu1 %v2885_v63 }
 0x3db   :  { %v1996_v12 = vpop.f32.mrb[8].mxu0  ;;  %v2034_v13 = vpop.f32.mrb[16].mxu1 }
 0x3dc   :  { %v845_v15 = vpop.f32.mrb[9].mxu0  ;;  %v964_v18 = vpop.f32.mrb[17].mxu1 }
 0x3dd   :  { %v2398_v53 = vpack.c.bf16 %v1996_v12, %v845_v15  ;;  %v2438_v57 = vpack.c.bf16 %v2034_v13, %v964_v18 }
 0x3df   :  { %v1999_v62 = vpop.f32.mrb[10].mxu0  ;;  %v2037_v1 = vpop.f32.mrb[18].mxu1  ;;  %2399 = vmatprep.subr.bf16.mxu0 %v2398_v53 }
 0x3e0   :  { %v855_v2 = vpop.f32.mrb[11].mxu0  ;;  %v974_v3 = vpop.f32.mrb[19].mxu1  ;;  %2401 = vmatpush3.bf16.msra.mxu0 %v2398_v53 }
 0x3e1   :  { %v2402_v4 = vpack.c.bf16 %v1999_v62, %v855_v2  ;;  %v2442_v5 = vpack.c.bf16 %v2037_v1, %v974_v3  ;;  %v1242_v2 = vld [vmem:[%s3187_s8] sm:$0x1] }
 0x3e3   :  { %2403 = vmatprep.subr.bf16.mxu0 %v2402_v4 }
 0x3e4   :  { %2405 = vmatpush3.bf16.msra.mxu0 %v2402_v4 }
 0x3e5   :  { %2407 = vmatprep.subr.bf16.mxu0 %v2406_v6 }
 0x3e7   :  { %2047 = vmatmul.mubr.msk.f32.vlgmr.msra.gmra.mrb[12].mxu0 %vm283_vm0, %v2762_v25  ;;  %v2418_v25 = vpack.c.bf16 %v1497_v19, %v1496_v17 }
 0x3e8   :  { %2409 = vmatpush3.bf16.msra.mxu0 %v2406_v6  ;;  %2049 = vmatprep.mubr.msk.f32.mxu0 %vm283_vm0, %v2767_v26  ;;  %v1498_v26 = vld [vmem:[%s3184_s2 + $0xc0] sm:$0xff] }
 0x3e9   :  { %2411 = vmatprep.subr.bf16.mxu0 %v2410_v9  ;;  %v2422_v22 = vpack.c.bf16 %v1499_v20, %v1498_v26 }
 0x3eb   :  { %2050 = vmatmul.mubr.msk.f32.gmra.mrb[14].mxu0 %vm283_vm0, %v2776_v27  ;;  %v1501_v27 = vld [vmem:[%s3184_s2 + $0xd8] sm:$0xff] }
 0x3ec   :  { %2413 = vmatpush3.bf16.msra.mxu0 %v2410_v9  ;;  %2084 = vmatprep.mubr.f32.mxu0 %v759_v49  ;;  %v2426_v24 = vpack.c.bf16 %v1501_v27, %v1500_v23 }
 0x3ed   :  { %2415 = vmatprep.subr.bf16.mxu0 %v2414_v16 }
 0x3f0   :  { %2417 = vmatpush3.bf16.msra.mxu0 %v2414_v16 }
 0x3f1   :  { %2419 = vmatprep.subr.bf16.mxu0 %v2418_v25 }
 0x3f4   :  { %2421 = vmatpush3.bf16.msra.mxu0 %v2418_v25 }
 0x3f5   :  { %2423 = vmatprep.subr.bf16.mxu0 %v2422_v22 }
 0x3f8   :  { %2425 = vmatpush3.bf16.msra.mxu0 %v2422_v22  ;;  %v2517_v22 = vld [vmem:[%s3180_s0] sm:$0xff] }
 0x3f9   :  { %2427 = vmatprep.subr.bf16.mxu0 %v2426_v24 }
 0x3fc   :  { %2429 = vmatpush3.bf16.msra.mxu0 %v2426_v24 }
 0x3fd   :  { %2431 = vmatprep.subr.bf16.mxu0 %v2430_v36 }
 0x400   :  { %2433 = vmatpush3.bf16.msra.mxu0 %v2430_v36 }
 0x401   :  { %2435 = vmatprep.subr.bf16.mxu0 %v2434_v39 }
 0x404   :  { %2437 = vmatpush3.bf16.msra.mxu0 %v2434_v39 }
 0x405   :  { %2439 = vmatprep.subr.bf16.mxu0 %v2438_v57 }
 0x407   :  { %2085 = vmatmul.mubr.f32.vlgmr.msra.gmra.mrb[12].mxu0 %v3039_v50 }
 0x408   :  { %2087 = vmatprep.mubr.f32.mxu0 %v3041_v52  ;;  %2441 = vmatpush3.bf16.msra.mxu0 %v2438_v57 }
 0x409   :  { %2443 = vmatprep.subr.bf16.mxu0 %v2442_v5 }
 0x40b   :  { %2088 = vmatmul.mubr.f32.gmra.mrb[14].mxu0 %v3047_v10 }
 0x40c   :  { %2445 = vmatpush3.bf16.msra.mxu0 %v2442_v5  ;;  %2098 = vmatprep.mubr.msk.f32.mxu0 %vm283_vm0, %v2781_v28  ;;  %v1243_v5 = vld [vmem:[%s3188_s9] sm:$0x1] }
 0x40d   :  { %2470 = vmatprep.subr.bf16.mxu0 %v2518_v31 }
 0x40f   :  { %2099 = vmatmul.mubr.msk.f32.vlgmr.msra.gmra.mrb[12].mxu0 %vm283_vm0, %v2790_v29 }
 0x410   :  { %2101 = vmatprep.mubr.msk.f32.mxu0 %vm283_vm0, %v2795_v30  ;;  %2472 = vmatpush3.bf16.msra.mxu0 %v2815_v35 }
 0x411   :  { %2473 = vmatprep.subr.bf16.mxu0 %v2518_v31 }
 0x413   :  { %2102 = vmatmul.mubr.msk.f32.gmra.mrb[14].mxu0 %vm283_vm0, %v2805_v32 }
 0x414   :  { %2475 = vmatpush3.bf16.msra.mxu0 %v2825_v40  ;;  %2171 = vmatprep.mubr.msk.f32.mxu0 %vm2519_vm1, %v2520_v0 }
 0x415   :  { %2476 = vmatprep.subr.bf16.mxu0 %v2518_v31 }
 0x418   :  { %2478 = vmatpush3.bf16.msra.mxu0 %v2835_v45 }
 0x419   :  { %2479 = vmatprep.subr.bf16.mxu0 %v2518_v31 }
 0x41c   :  { %2481 = vmatpush3.bf16.msra.mxu0 %v2845_v48 }
 0x41d   :  { %2482 = vmatprep.subr.bf16.mxu0 %v2518_v31 }
 0x420   :  { %2484 = vmatpush3.bf16.msra.mxu0 %v2855_v51 }
 0x421   :  { %2485 = vmatprep.subr.bf16.mxu0 %v2518_v31 }
 0x424   :  { %2487 = vmatpush3.bf16.msra.mxu0 %v2865_v56 }
 0x425   :  { %2488 = vmatprep.subr.bf16.mxu0 %v2518_v31 }
 0x428   :  { %2490 = vmatpush3.bf16.msra.mxu0 %v2875_v60 }
 0x429   :  { %2491 = vmatprep.subr.bf16.mxu0 %v2518_v31 }
 0x42c   :  { %2493 = vmatpush3.bf16.msra.mxu0 %v2885_v63 }
 0x4e2   :  { %v2100_v28 = vpop.f32.mrb[12].mxu0 }
 0x4e3   :  { %v1254_v29 = vmul.f32 %v2100_v28, %v2100_v28  ;;  %v1219_v30 = vpop.f32.mrb[13].mxu0 }
 0x4e4   :  { %v1244_v32 = vadd.f32 %v2100_v28, %v1219_v30  ;;  %v1253_v35 = vmul.f32 %v1219_v30, %v1219_v30 }
 0x4e6   :  { %v1257_v40 = vadd.f32 %v1254_v29, %v1253_v35  ;;  %v2103_v45 = vpop.f32.mrb[14].mxu0 }
 0x4e7   :  { %v1229_v48 = vpop.f32.mrb[15].mxu0  ;;  %v1256_v41 = vmul.f32 %v2103_v45, %v2103_v45 }
 0x4e8   :  { %v1245_v51 = vadd.f32 %v1244_v32, %v1229_v48  ;;  %v1255_v0 = vmul.f32 %v1229_v48, %v1229_v48 }
 0x4ea   :  { %v1246_v56 = vadd.f32 %v2103_v45, %v1245_v51  ;;  %v1258_v42 = vadd.f32 %v1257_v40, %v1255_v0 }
 0x4ec   :  { %v1247_v43 = vrot.slane %v1246_v56, 4  ;;  %v1259_v44 = vadd.f32 %v1258_v42, %v1256_v41 }
 0x4ee   :  { %v1248_v60 = vadd.f32 %v1247_v43, %v1246_v56  ;;  %v1260_v46 = vrot.slane %v1259_v44, 4 }
 0x4f0   :  { %v1249_v31 = vrot.slane %v1248_v60, 2  ;;  %v1261_v47 = vadd.f32 %v1260_v46, %v1259_v44 }
 0x4f2   :  { %v1250_v63 = vadd.f32 %v1249_v31, %v1248_v60  ;;  %v1262_v49 = vrot.slane %v1261_v47, 2 }
 0x4f4   :  { %v1251_v50 = vrot.slane %v1250_v63, 1  ;;  %v1263_v52 = vadd.f32 %v1262_v49, %v1261_v47 }
 0x4f6   :  { %v1252_v10 = vadd.f32 %v1251_v50, %v1250_v63  ;;  %v1264_v12 = vrot.slane %v1263_v52, 1 }
 0x4f8   :  { %2137 = vmatmul.mubr.f32.vlgmr.msra.gmra.mrb[20].mxu1 %v1252_v10  ;;  %v1265_v13 = vadd.f32 %v1264_v12, %v1263_v52 }
 0x4fa   :  { %2172 = vmatmul.mubr.f32.vlgmr.msra.gmra.mrb[16].mxu0 %v1265_v13 }
 0x5cb   :  { %v1332_v15 = vpop.f32.mrb[20].mxu1 }
 0x5cc   :  { %v1406_v18 = vmul.f32 %v1332_v15, %v1332_v15  ;;  %v2138_v53 = vpop.f32.mrb[21].mxu1 }
 0x5cd   :  { %v1402_v57 = vpop.f32.mrb[16].mxu0 }
 0x5ce   :  { %v1407_v58 = vsub.f32 %v1402_v57, %v1406_v18  ;;  %v2173_v61 = vpop.f32.mrb[17].mxu0 }
 0x5d0   :  { %v1408_v62 = vmax.f32 %v1407_v58, 0.0 }
 0x5d2   :  { %v1409_v1 = vadd.f32 1e-05, %v1408_v62 }
 0x5d4   :  { %2515 = vrsqrt.f32 %v1409_v1 }
 0x5de   :  { %v2516_v3 = vpop.eup %2515 }
 0x5df   :  { %v1411_v4 = vmul.f32 %v2516_v3, %v1242_v2 }
 0x5e1   :  { %v1412_v6 = vmul.f32 %v1411_v4, %v1332_v15  ;;  %v1418_v7 = vrot.slane %v1411_v4, %v3028_v21 }
 0x5e3   :  { %v1413_v8 = vsub.f32 %v1243_v5, %v1412_v6  ;;  %v1420_v9 = vmul.f32 %v1418_v7, %v1219_v30  ;;  %v1421_v11 = vmul.f32 %v2100_v28, %v1418_v7  ;;  %v1422_v14 = vmul.f32 %v1418_v7, %v1229_v48 }
 0x5e4   :  { %v1423_v16 = vmul.f32 %v2103_v45, %v1418_v7 }
 0x5e5   :  { %v1428_v17 = vrot.slane %v1413_v8, %v3028_v21 }
 0x5e7   :  { %v1430_v19 = vadd.f32 %v1428_v17, %v1420_v9  ;;  %v1431_v25 = vadd.f32 %v1428_v17, %v1421_v11  ;;  %v1432_v26 = vadd.f32 %v1428_v17, %v1422_v14  ;;  %v1433_v20 = vadd.f32 %v1428_v17, %v1423_v16 }
 0x5e9   :  { %v1434_v23 = vadd.f32 %v2517_v22, %v1430_v19  ;;  %v1435_v27 = vadd.f32 %v1431_v25, %v2694_v54  ;;  %v1436_v24 = vadd.f32 %v1432_v26, %v2699_v55  ;;  %v1437_v33 = vadd.f32 %v1433_v20, %v2712_v59 }
 0x5eb   :  { %v1438_v34 = vmax.f32 %v1434_v23, 0.0  ;;  %v1439_v36 = vmax.f32 %v1435_v27, 0.0  ;;  %v1440_v37 = vmax.f32 %v1436_v24, 0.0  ;;  %v1441_v38 = vmax.f32 %v1437_v33, 0.0 }
 0x5ed   :  { %1442 = vst [vmem:[%s3189_s10] sm:$0xff] %v1438_v34  ;;  %1443 = vst [vmem:[%s3189_s10 + $0x8] sm:$0xff] %v1439_v36 }
 0x5ee   :  { %1444 = vst [vmem:[%s3189_s10 + $0x10] sm:$0xff] %v1440_v37  ;;  %1445 = vst [vmem:[%s3189_s10 + $0x18] sm:$0xff] %v1441_v38 }

</bundles_post_ra>
